<compile_context>
chip_gen: v7x
topology: tpu7x:2x2x1
jax: 0.10.0
libtpu: 0.0.40
codegen_flags: <defaults>
</compile_context>

<pallas_src>
import functools
import math

import jax
import jax.numpy as jnp
import numpy as np
from jax.experimental import pallas as pl
from jax.experimental.pallas import tpu as pltpu


# --------------------------------------------------------------------------- #
# Helpers
# --------------------------------------------------------------------------- #
def _round_up(x, m):
    return (x + m - 1) // m * m


def _cdiv(a, b):
    return (a + b - 1) // b


def _pad_2d(a, rows, cols):
    if a.shape == (rows, cols):
        return a
    return jnp.zeros((rows, cols), a.dtype).at[: a.shape[0], : a.shape[1]].set(a)


def _apply_activation(out, activation):
    if activation in (None, "linear"):
        return out
    if activation == "relu":
        return jnp.maximum(out, 0.0)
    if activation == "sigmoid":
        return jax.nn.sigmoid(out)            # EUP transcendental
    if activation == "tanh":
        return jnp.tanh(out)                  # EUP transcendental
    if activation == "leaky_relu":
        return jnp.where(out > 0, out, 0.01 * out)
    if activation == "elu":
        return jnp.where(out > 0, out, jnp.expm1(out))
    if activation == "selu":
        alpha, lam = 1.6732632423543772, 1.0507009873554805
        return lam * jnp.where(out > 0, out, alpha * jnp.expm1(out))
    if activation == "swish":
        return out * jax.nn.sigmoid(out)
    raise ValueError(f"unsupported activation: {activation}")


# --------------------------------------------------------------------------- #
# Kernel 1: per-output-channel column scale (K-chunked row-norm reduction)
#   col_scale[n] = weight_scale[n] * rsqrt(sum_k W[n,k]^2 + 1e-8) * wcs
# --------------------------------------------------------------------------- #
def _col_scale_kernel(w_ref, scale_ref, cs_ref, acc_ref, *, weight_correction_scale):
    k = pl.program_id(1)

    @pl.when(k == 0)
    def _():
        acc_ref[...] = jnp.zeros_like(acc_ref)

    w32 = w_ref[...].astype(jnp.float32)                         # (bn2, bk2)
    ones = jnp.ones((1, w32.shape[1]), jnp.float32)              # constant, folded
    # sum_k W[n,k]^2 produced directly lane-major as (1, bn2) via the MXU
    # (avoids an XLU transpose of a (bn2, 1) vector).
    acc_ref[...] += jax.lax.dot_general(
        ones, w32 * w32,
        dimension_numbers=(((1,), (1,)), ((), ())),
        preferred_element_type=jnp.float32,
    )

    @pl.when(k == pl.num_programs(1) - 1)
    def _():
        cs_ref[...] = (
            scale_ref[...].astype(jnp.float32)
            * jax.lax.rsqrt(acc_ref[...] + 1e-8)
            * weight_correction_scale
        )


# --------------------------------------------------------------------------- #
# Kernel 2: main matmul + per-column rescale + bias + activation
# --------------------------------------------------------------------------- #
def _normalized_linear_kernel(x_ref, w_ref, cs_ref, b_ref, o_ref, acc_ref,
                              *, activation, use_bf16_mxu):
    k = pl.program_id(2)

    @pl.when(k == 0)
    def _():
        acc_ref[...] = jnp.zeros_like(acc_ref)

    x = x_ref[...]
    w = w_ref[...]
    if use_bf16_mxu and x.dtype == jnp.float32:
        # Opt-in lower-precision MXU path (v6e/v7x bf16 throughput).
        x = x.astype(jnp.bfloat16)
        w = w.astype(jnp.bfloat16)

    # x @ W.T without materializing a transpose: contract last dims of both.
    acc_ref[...] += jax.lax.dot_general(
        x, w,
        dimension_numbers=(((1,), (1,)), ((), ())),
        preferred_element_type=jnp.float32,
    )                                                            # (bm, bn) f32

    @pl.when(k == pl.num_programs(2) - 1)
    def _():
        out = acc_ref[...] * cs_ref[...] + b_ref[...].astype(jnp.float32)
        out = _apply_activation(out, activation)
        o_ref[...] = out.astype(o_ref.dtype)


# --------------------------------------------------------------------------- #
# VMEM budget + tile selection
# --------------------------------------------------------------------------- #
def _vmem_budget():
    """Generation-aware (budget_for_tiles, scoped_vmem_limit) in bytes."""
    mib = 1024 * 1024
    try:
        phys = int(pltpu.get_tpu_info().vmem_capacity_bytes)
    except Exception:
        phys = 64 * mib                      # conservative fallback (v7x-sized)
    if phys >= 100 * mib:                    # v5e / v6e: 128 MiB physical
        budget = 96 * mib
    else:                                    # v7x: 64 MiB physical
        budget = (phys * 2) // 3
    limit = min(phys - 8 * mib, budget + 16 * mib)
    return budget, max(limit, budget)


def _estimate_vmem(bm, bn, bk, x_it, w_it, o_it):
    x_buf = 2 * bm * bk * x_it               # double-buffered x tile
    w_buf = 2 * bn * bk * w_it               # double-buffered W tile
    o_buf = 2 * bm * bn * o_it               # double-buffered output tile
    acc = bm * bn * 4                        # f32 accumulator scratch
    vecs = 2 * 2 * bn * 4                    # col_scale + bias tiles
    temp = bm * bn * 4                       # epilogue f32 temporary headroom
    return x_buf + w_buf + o_buf + acc + vecs + temp


def _choose_tiles(m_total, n_total, k_total, sub, x_it, w_it, o_it, budget):
    """Pick (block_m, block_n, block_k) that fit `budget` with low padding waste."""
    # block_n: widest MXU-dense width that divides the 128-aligned out_dim
    # (avoids padded W columns -> no wasted W traffic / MXU work).
    bn = 128
    for cand in (512, 256):
        if cand <= n_total and n_total % cand == 0:
            bn = cand
            break

    # block_m candidates (descending), preferring <= ~6% padding waste.
    cands = set()
    for c in (1024, 512, 256, 128, 64, 32, 16, 8):
        cands.add(_round_up(min(c, m_total), sub))
    cands.add(m_total)
    cands = sorted(cands, reverse=True)

    def waste(bm):
        return _cdiv(m_total, bm) * bm - m_total

    low_waste = [c for c in cands if 16 * waste(c) <= m_total]
    ordered = low_waste + [c for c in cands if c not in low_waste]

    # block_k candidates: full K first, then halves (>=512, multiples of 128).
    bks = [k_total]
    bk = k_total
    while bk > 512:
        bk = max(512, _round_up(bk // 2, 128))
        bks.append(bk)

    for bn_c in dict.fromkeys((bn, 256, 128)):
        if bn_c > n_total or n_total % bn_c:
            continue
        for bm_c in ordered:
            for bk_c in bks:
                if _estimate_vmem(bm_c, bn_c, bk_c, x_it, w_it, o_it) <= budget:
                    return bm_c, bn_c, bk_c
    return max(sub, 8), 128, min(k_total, 512)   # last-resort minimal tiles


# --------------------------------------------------------------------------- #
# Wrapper
# --------------------------------------------------------------------------- #
def normalized_rescale_linear(x, weight, weight_scale, bias=None, *,
                              weight_correction_scale=2 ** 0.5,
                              activation=None,
                              use_bf16_mxu=False,
                              block_m=None, block_n=None, block_k=None):
    """x: (..., in_dim) -> (..., out_dim), matching F.linear conventions."""
    in_dim = x.shape[-1]
    out_dim = weight.shape[0]
    lead_shape = x.shape[:-1]
    x2d = x.reshape(-1, in_dim)
    batch = x2d.shape[0]

    x_it = jnp.dtype(x.dtype).itemsize
    w_it = jnp.dtype(weight.dtype).itemsize
    o_it = x_it
    # dtype-aware sublane multiple: f32 -> 8, bf16 -> 16, int8/fp8 -> 32
    sub = max(8, 32 // x_it)

    k_aln = _round_up(in_dim, 128)
    n_aln = _round_up(out_dim, 128)
    m_aln = _round_up(max(batch, 1), sub)

    budget, vmem_limit = _vmem_budget()
    bm_auto, bn_auto, bk_auto = _choose_tiles(
        m_aln, n_aln, k_aln, sub, x_it, w_it, o_it, budget)
    block_m = bm_auto if block_m is None else _round_up(min(block_m, m_aln), sub)
    block_n = bn_auto if block_n is None else min(_round_up(block_n, 128), n_aln)
    block_k = bk_auto if block_k is None else min(_round_up(block_k, 128), k_aln)

    grid_m = _cdiv(m_aln, block_m)
    grid_n = _cdiv(n_aln, block_n)
    grid_k = _cdiv(k_aln, block_k)
    m_pad = grid_m * block_m
    n_pad = grid_n * block_n
    k_pad = grid_k * block_k

    # ---- zero-pad operands (dense MXU tiles, lane-dense unmasked stores) ---- #
    x_p = _pad_2d(x2d, m_pad, k_pad)
    w_p = _pad_2d(weight, n_pad, k_pad)
    scale_p = jnp.zeros((1, n_pad), jnp.float32).at[0, :out_dim].set(
        weight_scale.astype(jnp.float32).reshape(-1))
    b = bias if bias is not None else jnp.zeros((out_dim,), jnp.float32)
    bias_p = jnp.zeros((1, n_pad), jnp.float32).at[0, :out_dim].set(
        b.astype(jnp.float32).reshape(-1))

    # ---- pass 1: per-output-channel scale (tiny; K-chunked) ---------------- #
    bn2 = 256 if (n_pad >= 256 and n_pad % 256 == 0) else 128
    bk2 = 128
    for c in (1024, 512, 256, 128):
        if c <= k_pad and k_pad % c == 0:
            bk2 = c
            break

    col_scale = pl.pallas_call(
        functools.partial(_col_scale_kernel,
                          weight_correction_scale=float(weight_correction_scale)),
        out_shape=jax.ShapeDtypeStruct((1, n_pad), jnp.float32),
        grid_spec=pltpu.PrefetchScalarGridSpec(
            num_scalar_prefetch=0,
            grid=(n_pad // bn2, k_pad // bk2),
            in_specs=[
                pl.BlockSpec((bn2, bk2), lambda j, k: (j, k)),     # W slab
                pl.BlockSpec((1, bn2), lambda j, k: (0, j)),       # weight_scale
            ],
            out_specs=pl.BlockSpec((1, bn2), lambda j, k: (0, j)),
            scratch_shapes=[pltpu.VMEM((1, bn2), jnp.float32)],
        ),
        compiler_params=pltpu.CompilerParams(
            dimension_semantics=("parallel", "arbitrary")),
    )(w_p, scale_p)

    # ---- pass 2: matmul + epilogue ----------------------------------------- #
    transcendental_acts = ("sigmoid", "tanh", "swish", "elu", "selu")
    cost = pl.CostEstimate(
        flops=2 * m_pad * n_pad * k_pad,
        transcendentals=(m_pad * n_pad) if activation in transcendental_acts else 0,
        bytes_accessed=(m_pad * k_pad * x_it
                        + grid_m * n_pad * k_pad * w_it
                        + m_pad * n_pad * o_it),
    )

    kernel = functools.partial(_normalized_linear_kernel,
                               activation=activation,
                               use_bf16_mxu=bool(use_bf16_mxu))

    out = pl.pallas_call(
        kernel,
        out_shape=jax.ShapeDtypeStruct((m_pad, n_pad), x.dtype),
        grid_spec=pltpu.PrefetchScalarGridSpec(
            num_scalar_prefetch=0,
            # batch outer (parallel, megacore-shardable; x tile resident across
            # the inner N sweep when grid_k == 1), N middle (parallel),
            # K reduction innermost (arbitrary, accumulator in scratch).
            grid=(grid_m, grid_n, grid_k),
            in_specs=[
                pl.BlockSpec((block_m, block_k), lambda i, j, k: (i, k)),   # x
                pl.BlockSpec((block_n, block_k), lambda i, j, k: (j, k)),   # W
                pl.BlockSpec((1, block_n),       lambda i, j, k: (0, j)),   # col_scale
                pl.BlockSpec((1, block_n),       lambda i, j, k: (0, j)),   # bias
            ],
            out_specs=pl.BlockSpec((block_m, block_n), lambda i, j, k: (i, j)),
            scratch_shapes=[pltpu.VMEM((block_m, block_n), jnp.float32)],
        ),
        compiler_params=pltpu.CompilerParams(
            dimension_semantics=("parallel", "parallel", "arbitrary"),
            vmem_limit_bytes=int(vmem_limit),
        ),
        cost_estimate=cost,
    )(x_p, w_p, col_scale, bias_p)

    out = out[:batch, :out_dim]
    return out.reshape(*lead_shape, out_dim)


# --------------------------------------------------------------------------- #
# Reference + tests
# --------------------------------------------------------------------------- #
def _reference(x, weight, weight_scale, bias, weight_correction_scale, activation):
    norm_inv = jax.lax.rsqrt(jnp.sum(weight.astype(jnp.float32) ** 2,
                                     axis=1, keepdims=True) + 1e-8)
    w_eff = weight_scale[:, None] * (weight * norm_inv) * weight_correction_scale
    out = x @ w_eff.T
    if bias is not None:
        out = out + bias[None, :]
    return _apply_activation(out, activation)


if __name__ == "__main__":
    key = jax.random.PRNGKey(0)
    wcs = 2 ** 0.5

    # ---- test 1: module-default config, tiny shapes ------------------------ #
    batch, in_dim, out_dim = 8, 32, 32
    k1, k2 = jax.random.split(key)
    x = jax.random.normal(k1, (batch, in_dim), dtype=jnp.float32)
    # kaiming_normal_(fan_in, relu) -> std = sqrt(2 / in_dim)
    weight = jax.random.normal(k2, (out_dim, in_dim), jnp.float32) * math.sqrt(2.0 / in_dim)
    weight_scale = jnp.ones((out_dim,), jnp.float32)
    bias = jnp.zeros((out_dim,), jnp.float32)

    out = normalized_rescale_linear(x, weight, weight_scale, bias,
                                    weight_correction_scale=wcs, activation=None)
    out = jax.block_until_ready(out)
    ref = _reference(x, weight, weight_scale, bias, wcs, None)
    np.testing.assert_allclose(np.asarray(out), np.asarray(ref), rtol=1e-5, atol=1e-5)

    # ---- test 2: unaligned dims, leading batch dims, relu ------------------ #
    k3, k4, k5, k6 = jax.random.split(key, 4)
    in_dim2, out_dim2 = 48, 160
    x2 = jax.random.normal(k3, (2, 3, in_dim2), dtype=jnp.float32)
    weight2 = jax.random.normal(k4, (out_dim2, in_dim2), jnp.float32) * math.sqrt(2.0 / in_dim2)
    weight_scale2 = 1.0 + 0.1 * jax.random.normal(k5, (out_dim2,), jnp.float32)
    bias2 = 0.05 * jax.random.normal(k6, (out_dim2,), jnp.float32)

    out2 = normalized_rescale_linear(x2, weight2, weight_scale2, bias2,
                                     weight_correction_scale=wcs, activation="relu")
    out2 = jax.block_until_ready(out2)
    ref2 = _reference(x2, weight2, weight_scale2, bias2, wcs, "relu")
    np.testing.assert_allclose(np.asarray(out2), np.asarray(ref2), rtol=1e-5, atol=1e-5)

    # ---- test 3: forced small tiles -> exercises K/N/M multi-tile grid,
    #              no bias, tanh activation ---------------------------------- #
    k7, k8, k9 = jax.random.split(jax.random.PRNGKey(0), 3)
    batch3, in_dim3, out_dim3 = 16, 200, 200
    x3 = jax.random.normal(k7, (batch3, in_dim3), dtype=jnp.float32)
    weight3 = jax.random.normal(k8, (out_dim3, in_dim3), jnp.float32) * math.sqrt(2.0 / in_dim3)
    weight_scale3 = 1.0 + 0.1 * jax.random.normal(k9, (out_dim3,), jnp.float32)

    out3 = normalized_rescale_linear(x3, weight3, weight_scale3, None,
                                     weight_correction_scale=wcs, activation="tanh",
                                     block_m=8, block_n=128, block_k=128)
    out3 = jax.block_until_ready(out3)
    ref3 = _reference(x3, weight3, weight_scale3, None, wcs, "tanh")
    np.testing.assert_allclose(np.asarray(out3), np.asarray(ref3), rtol=1e-5, atol=1e-5)

    print("KERNEL_OK")
</pallas_src>

<mosaic_0001>
module attributes {stable_mosaic.version = 11 : i64} {
  func.func @_col_scale_kernel(%arg0: i32, %arg1: i32, %arg2: memref<128x128xf32, #tpu.memory_space<vmem>>, %arg3: memref<1x128xf32, #tpu.memory_space<vmem>>, %arg4: memref<1x128xf32, #tpu.memory_space<vmem>>, %arg5: memref<1x128xf32, #tpu.memory_space<vmem>>) attributes {dimension_semantics = [#tpu.dimension_semantics<parallel>, #tpu.dimension_semantics<arbitrary>], iteration_bounds = array<i64: 1, 1>, scalar_prefetch = 0 : i64, scratch_operands = 1 : i64, tpu.core_type = #tpu.core_type<tc>, window_params = [{transform_indices = @transform_0, window_bounds = array<i64: 128, 128>}, {transform_indices = @transform_1, window_bounds = array<i64: 1, 128>}, {transform_indices = @transform_2, window_bounds = array<i64: 1, 128>}]} {
    %c0_i32 = arith.constant 0 : i32
    %0 = arith.cmpi eq, %arg1, %c0_i32 : i32
    %1 = arith.extui %0 : i1 to i32
    %c0_i32_0 = arith.constant 0 : i32
    %2 = arith.cmpi ne, %1, %c0_i32_0 : i32
    scf.if %2 {
      %cst_9 = arith.constant 0.000000e+00 : f32
      %13 = vector.broadcast %cst_9 : f32 to vector<1x128xf32>
      %c0_10 = arith.constant 0 : index
      %c0_11 = arith.constant 0 : index
      %14 = vector.load %arg5[%c0_10, %c0_11] : memref<1x128xf32, #tpu.memory_space<vmem>>, vector<1x128xf32>
      tpu.vector_store %arg5[%c0_10, %c0_11], %13 {strides = array<i32>} : memref<1x128xf32, #tpu.memory_space<vmem>>, vector<1x128xf32>,
    } else {
    }
    %c0 = arith.constant 0 : index
    %c0_1 = arith.constant 0 : index
    %3 = vector.load %arg2[%c0, %c0_1] : memref<128x128xf32, #tpu.memory_space<vmem>>, vector<128x128xf32>
    %cst = arith.constant 1.000000e+00 : f32
    %4 = vector.broadcast %cst : f32 to vector<1x128xf32>
    %c0_2 = arith.constant 0 : index
    %c0_3 = arith.constant 0 : index
    %5 = vector.load %arg5[%c0_2, %c0_3] : memref<1x128xf32, #tpu.memory_space<vmem>>, vector<1x128xf32>
    %6 = arith.mulf %3, %3 : vector<128x128xf32>
    %cst_4 = arith.constant dense<0.000000e+00> : vector<1x128xf32>
    %7 = tpu.matmul %4, %6, %cst_4 {dimension_numbers = #tpu.dot_dimension_numbers<[1], [1], [0], [0], [0, 0, 1, 0], [], []>} : vector<1x128xf32>, vector<128x128xf32>, vector<1x128xf32> -> vector<1x128xf32>
    %8 = arith.addf %5, %7 : vector<1x128xf32>
    %c0_5 = arith.constant 0 : index
    %c0_6 = arith.constant 0 : index
    %9 = vector.load %arg5[%c0_5, %c0_6] : memref<1x128xf32, #tpu.memory_space<vmem>>, vector<1x128xf32>
    tpu.vector_store %arg5[%c0_5, %c0_6], %8 {strides = array<i32>} : memref<1x128xf32, #tpu.memory_space<vmem>>, vector<1x128xf32>,
    %c0_i32_7 = arith.constant 0 : i32
    %10 = arith.cmpi eq, %arg1, %c0_i32_7 : i32
    %11 = arith.extui %10 : i1 to i32
    %c0_i32_8 = arith.constant 0 : i32
    %12 = arith.cmpi ne, %11, %c0_i32_8 : i32
    scf.if %12 {
      %c0_9 = arith.constant 0 : index
      %c0_10 = arith.constant 0 : index
      %13 = vector.load %arg3[%c0_9, %c0_10] : memref<1x128xf32, #tpu.memory_space<vmem>>, vector<1x128xf32>
      %c0_11 = arith.constant 0 : index
      %c0_12 = arith.constant 0 : index
      %14 = vector.load %arg5[%c0_11, %c0_12] : memref<1x128xf32, #tpu.memory_space<vmem>>, vector<1x128xf32>
      %cst_13 = arith.constant 9.99999993E-9 : f32
      %15 = vector.broadcast %cst_13 : f32 to vector<1x128xf32>
      %16 = arith.addf %14, %15 : vector<1x128xf32>
      %17 = math.rsqrt %16 : vector<1x128xf32>
      %18 = arith.mulf %13, %17 : vector<1x128xf32>
      %cst_14 = arith.constant 1.41421354 : f32
      %19 = vector.broadcast %cst_14 : f32 to vector<1x128xf32>
      %20 = arith.mulf %18, %19 : vector<1x128xf32>
      %c0_15 = arith.constant 0 : index
      %c0_16 = arith.constant 0 : index
      %21 = vector.load %arg4[%c0_15, %c0_16] : memref<1x128xf32, #tpu.memory_space<vmem>>, vector<1x128xf32>
      tpu.vector_store %arg4[%c0_15, %c0_16], %20 {strides = array<i32>} : memref<1x128xf32, #tpu.memory_space<vmem>>, vector<1x128xf32>,
    } else {
    }
    return
  }
  func.func @transform_0(%arg0: i32, %arg1: i32) -> (i32, i32) {
    %c0_i32 = arith.constant 0 : i32
    return %arg0, %arg1 : i32, i32
  }
  func.func @transform_1(%arg0: i32, %arg1: i32) -> (i32, i32) {
    %c0_i32 = arith.constant 0 : i32
    %c0_i32_0 = arith.constant 0 : i32
    return %c0_i32, %arg0 : i32, i32
  }
  func.func @transform_2(%arg0: i32, %arg1: i32) -> (i32, i32) {
    %c0_i32 = arith.constant 0 : i32
    %c0_i32_0 = arith.constant 0 : i32
    return %c0_i32, %arg0 : i32, i32
  }
}

</mosaic_0001>

<bundles_post_ra>
// kernel: tpu_custom_call.1
= control target key start
LH: loop header
LB: loop body
LE: loop exit
PB: predicated region body
PF: predicated region fallthrough
CT: control target
= control target key end

     0   :  { %7 = vsyncpa [#allocation4], 0  ;;  %s345_s0 = inlined_call_operand.hbm [shape: f32[128,128], index: 0, kind: input, shape index: {}]   ;;  %s346_s1 = inlined_call_operand.vmem [shape: f32[1,128], index: 1, kind: input, shape index: {}]   ;;  %s347_s2 = inlined_call_operand.hbm [shape: f32[1,128], index: 2, kind: output, shape index: {}]  }
   0x1   :  { %8 = vsyncpa [#allocation5], 0  ;;  %s295_s9 = smov [#allocation3]   ;;  %s247_s13 = scalar_lea.hbm %s345_s0, 2048 }
   0x2   :  { %s14_s10 = sshll.u32 %s295_s9, 4  ;;  %p248_p0 = scmp.ne.s32.totalorder %s345_s0, %s247_s13  ;;  %s15_s10 = int_to_ptr.vmem [resolvable:$true] %s14_s10 }
   0x3   :  { %p251_p1 = scmp.lt.u32.totalorder %s247_s13, %s345_s0 }
   0x5   :  { %p253_p2 = pnand %p251_p1, %p248_p0 }
   0x7   :  { %256 = shalt.err (!%p253_p2)
}
   0x8   :  { %s257_s18 = scalar_lea.vmem %s15_s10, 2048  ;;  %p262_p4 = scmp.lt.s32.totalorder %s15_s10, %s15_s10 }
   0x9   :  { %p258_p3 = scmp.ne.s32.totalorder %s15_s10, %s257_s18  ;;  %p263_p5 = scmp.lt.s32.totalorder %s257_s18, %s257_s18 }
   0xb   :  { %p264_p6 = por %p263_p5, %p262_p4 }
   0xd   :  { %p265_p7 = pnand %p264_p6, %p258_p3 }
   0xf   :  { %268 = shalt.err (!%p265_p7)
}
  0x10   :  { %s296_s19 = smov 128   ;;  %s297_s20 = smov 8  }
  0x11   :  { %20 = dma.hbm_to_vmem [thread:$0]  %s345_s0, 2048, %s15_s10, [#allocation4], %s296_s19, %s296_s19, %s297_s20  }
  0x12   :  { %291 = dma.done.wait [#allocation4], 2048  }
  0x13   :  { %292 = vsyncadd [#allocation4], 4294965248  ;;  %v298_v0 = vmov 0.0|0.0   ;;  %v299_v1 = vmov 0.0   ;;  %vm300_vm0 = vmmov 0   ;;  %v31_v2 = vld [vmem:[#allocation3] sm:$0xff] }
  0x14   :  { %213 = vmatprep.subr.bf16.mxu0 %v298_v0  ;;  %30 = vst [vmem:[#allocation2] sm:$0x1] %v299_v1  ;;  %210 = vmatprep.mubr.msk.f32.mxu0 %vm300_vm0, %v299_v1  ;;  %v32_v3 = vld [vmem:[#allocation3 + $0x8] sm:$0xff]  ;;  %v48_v4 = vmul.f32 %v31_v2, %v31_v2  ;;  %v33_v6 = vld [vmem:[#allocation3 + $0x10] sm:$0xff]  ;;  %v34_v7 = vld [vmem:[#allocation3 + $0x18] sm:$0xff]  ;;  %v301_v42 = vmov 1.0  }
  0x15   :  { %v49_v5 = vmul.f32 %v32_v3, %v32_v3  ;;  %v50_v9 = vmul.f32 %v33_v6, %v33_v6  ;;  %v51_v10 = vmul.f32 %v34_v7, %v34_v7  ;;  %v35_v12 = vld [vmem:[#allocation3 + $0x20] sm:$0xff]  ;;  %v36_v13 = vld [vmem:[#allocation3 + $0x28] sm:$0xff]  ;;  %v37_v17 = vld [vmem:[#allocation3 + $0x30] sm:$0xff]  ;;  %s302_s24 = smov [#allocation6]  }
  0x16   :  { %v52_v14 = vmul.f32 %v35_v12, %v35_v12  ;;  %v53_v15 = vmul.f32 %v36_v13, %v36_v13  ;;  %v38_v18 = vld [vmem:[#allocation3 + $0x38] sm:$0xff]  ;;  %v54_v19 = vmul.f32 %v37_v17, %v37_v17  ;;  %v39_v22 = vld [vmem:[#allocation3 + $0x40] sm:$0xff]  ;;  %v40_v23 = vld [vmem:[#allocation3 + $0x48] sm:$0xff]  ;;  %s152_s25 = sshll.u32 %s302_s24, 4  ;;  %s153_s25 = int_to_ptr.vmem [resolvable:$true] %s152_s25 }
  0x17   :  { %v214_v8 = vpack.c.bf16 %v49_v5, %v48_v4  ;;  %v217_v11 = vpack.c.bf16 %v51_v10, %v50_v9  ;;  %v55_v20 = vmul.f32 %v38_v18, %v38_v18  ;;  %v56_v24 = vmul.f32 %v39_v22, %v39_v22  ;;  %v41_v27 = vld [vmem:[#allocation3 + $0x50] sm:$0xff]  ;;  %v42_v28 = vld [vmem:[#allocation3 + $0x58] sm:$0xff]  ;;  %v43_v32 = vld [vmem:[#allocation3 + $0x60] sm:$0xff]  ;;  %s269_s26 = scalar_lea.vmem %s153_s25, 16  ;;  %s273_s27 = scalar_lea.vmem %s153_s25, 32 }
  0x18   :  { %v220_v16 = vpack.c.bf16 %v53_v15, %v52_v14  ;;  %v57_v25 = vmul.f32 %v40_v23, %v40_v23  ;;  %v58_v29 = vmul.f32 %v41_v27, %v41_v27  ;;  %v59_v30 = vmul.f32 %v42_v28, %v42_v28  ;;  %v44_v33 = vld [vmem:[#allocation3 + $0x68] sm:$0xff]  ;;  %v45_v37 = vld [vmem:[#allocation3 + $0x70] sm:$0xff]  ;;  %v46_v38 = vld [vmem:[#allocation3 + $0x78] sm:$0xff]  ;;  %p270_p8 = scmp.ne.s32.totalorder %s153_s25, %s269_s26  ;;  %p274_p9 = scmp.lt.s32.totalorder %s153_s25, %s153_s25 }
  0x19   :  { %215 = vmatpush3.bf16.xpose.msra.mxu0 %v214_v8  ;;  %v223_v21 = vpack.c.bf16 %v55_v20, %v54_v19  ;;  %v60_v34 = vmul.f32 %v43_v32, %v43_v32  ;;  %v61_v35 = vmul.f32 %v44_v33, %v44_v33  ;;  %v62_v39 = vmul.f32 %v45_v37, %v45_v37  ;;  %v139_v49 = vld [vmem:[%s346_s1] sm:$0x1]  ;;  %p275_p10 = scmp.lt.s32.totalorder %s273_s27, %s269_s26 }
  0x1a   :  { %216 = vmatprep.subr.bf16.mxu0 %v298_v0  ;;  %v226_v26 = vpack.c.bf16 %v57_v25, %v56_v24  ;;  %v229_v31 = vpack.c.bf16 %v59_v30, %v58_v29  ;;  %v63_v40 = vmul.f32 %v46_v38, %v46_v38 }
  0x1b   :  { %v232_v36 = vpack.c.bf16 %v61_v35, %v60_v34  ;;  %v47_v43 = vld [vmem:[#allocation2] sm:$0x1]  ;;  %p276_p11 = por %p275_p10, %p274_p9 }
  0x1c   :  { %v235_v41 = vpack.c.bf16 %v63_v40, %v62_v39 }
  0x1d   :  { %p277_p12 = pnand %p276_p11, %p270_p8 }
  0x21   :  { %218 = vmatpush3.bf16.xpose.msra.mxu0 %v217_v11 }
  0x22   :  { %219 = vmatprep.subr.bf16.mxu0 %v298_v0 }
  0x29   :  { %221 = vmatpush3.bf16.xpose.msra.mxu0 %v220_v16 }
  0x2a   :  { %222 = vmatprep.subr.bf16.mxu0 %v298_v0 }
  0x31   :  { %224 = vmatpush3.bf16.xpose.msra.mxu0 %v223_v21 }
  0x32   :  { %225 = vmatprep.subr.bf16.mxu0 %v298_v0 }
  0x39   :  { %227 = vmatpush3.bf16.xpose.msra.mxu0 %v226_v26 }
  0x3a   :  { %228 = vmatprep.subr.bf16.mxu0 %v298_v0 }
  0x41   :  { %230 = vmatpush3.bf16.xpose.msra.mxu0 %v229_v31 }
  0x42   :  { %231 = vmatprep.subr.bf16.mxu0 %v298_v0 }
  0x49   :  { %233 = vmatpush3.bf16.xpose.msra.mxu0 %v232_v36 }
  0x4a   :  { %234 = vmatprep.subr.bf16.mxu0 %v298_v0 }
  0x51   :  { %236 = vmatpush3.bf16.xpose.msra.mxu0 %v235_v41 }
  0x58   :  { %211 = vmatmul.mubr.f32.vlgmr.msra.gmra.mrb[0].mxu0 %v301_v42 }
 0x12b   :  { %v130_v44 = vpop.f32.mrb[0].mxu0 }
 0x12c   :  { %v134_v45 = vadd.f32 %v130_v44, %v47_v43  ;;  %v212_v46 = vpop.f32.mrb[1].mxu0 }
 0x12e   :  { %135 = vst [vmem:[#allocation2] sm:$0x1] %v134_v45 }
 0x135   :  { %v140_v47 = vld [vmem:[#allocation2] sm:$0x1] }
 0x136   :  { %v141_v48 = vadd.f32 1e-08, %v140_v47 }
 0x138   :  { %245 = vrsqrt.f32 %v141_v48 }
 0x142   :  { %v246_v50 = vpop.eup %245 }
 0x143   :  { %v143_v51 = vmul.f32 %v246_v50, %v139_v49 }
 0x145   :  { %v144_v52 = vmul.f32 1.4142135, %v143_v51 }
 0x147   :  { %145 = vst [vmem:[#allocation6] sm:$0x1] %v144_v52 }
 0x148   :  { %280 = shalt.err (!%p277_p12)
}
 0x149   :  { %s281_s30 = scalar_lea.hbm %s347_s2, 16 }
 0x14a   :  { %p282_p13 = scmp.ne.s32.totalorder %s347_s2, %s281_s30  ;;  %p285_p0 = scmp.lt.u32.totalorder %s281_s30, %s347_s2 }
 0x14c   :  { %p287_p1 = pnand %p285_p0, %p282_p13 }
 0x14e   :  { %290 = shalt.err (!%p287_p1)
}
 0x14f   :  { %155 = dma.vmem_to_hbm [thread:$0]  %s153_s25, 16, %s347_s2, [#allocation5]  }
 0x150   :  { %293 = dma.done.wait [#allocation5], 16  }
 0x151   :  { %294 = vsyncadd [#allocation5], 4294967280 }
 0x152   :  { %159 = vsyncpa [#allocation4], 1 }
 0x153   :  { %160 = vsyncpa [#allocation5], 1 }

</bundles_post_ra>
